<compile_context>
chip_gen: v7x
topology: tpu7x:2x2x1
jax: 0.10.0
libtpu: 0.0.40
codegen_flags: <defaults>
</compile_context>

<pallas_src>
import jax
import jax.numpy as jnp
from jax.experimental import pallas as pl
from jax.experimental.pallas import tpu as pltpu

EPS = 1e-6  # RMSNorm eps


def _round_up(n, m):
    return ((n + m - 1) // m) * m


def _silu(v):
    return v * jax.nn.sigmoid(v)


def _rmsnorm_ct(h, g, c_real):
    # Channels live on the sublane axis (axis 0); padded channels are exactly zero
    # (zero-padded weights/bias), so dividing by the *real* channel count is correct.
    # NOTE: callers must never pass pre-padded params with garbage in the pad region.
    ms = jnp.sum(h * h, axis=0, keepdims=True) * (1.0 / c_real)
    return h * jax.lax.rsqrt(ms + EPS) * g


def _make_kernel(TT, cout_real, use_res_conv):
    def kernel(x_ref, xh_ref, m_ref, temb_ref, w1_ref, w2_ref, cp_ref, *rest):
        if use_res_conv:
            wr_ref, o_ref = rest
        else:
            (o_ref,) = rest

        x = x_ref[0]                       # (Cin_p, TT)   compute dtype
        xh = xh_ref[0, 0]                  # (Cin_p, 4)    mask-multiplied halo columns
        m = m_ref[0, 0]                    # (1, TT+4)     window mask, values 0/1
        temb = temb_ref[0]                 # (Cout_p, 1)   f32
        cdt = x.dtype
        f32 = jnp.float32

        b1 = cp_ref[:, 0:1]
        g1 = cp_ref[:, 1:2]
        b2 = cp_ref[:, 2:3]
        g2 = cp_ref[:, 3:4]

        m_c = m[:, 2:TT + 2]               # mask over the TT output columns
        xm = x * m_c                       # masked main block (Cin_p, TT)

        # Place halo columns: left halo -> lanes 126/127 of a 128-wide strip,
        # right halo -> lanes 0/1 of another.  Sandwiching the main block between the
        # two strips is a fully lane-aligned concat; the masked conv window is then the
        # contiguous lane range 126 .. TT+129 of `xcat`.
        lane = jax.lax.broadcasted_iota(jnp.int32, (1, 128), 1)
        hl = (jnp.where(lane == 126, xh[:, 0:1], 0)
              + jnp.where(lane == 127, xh[:, 1:2], 0))
        hr = (jnp.where(lane == 0, xh[:, 2:3], 0)
              + jnp.where(lane == 1, xh[:, 3:4], 0))
        xcat = jnp.concatenate([hl, xm, hr], axis=1)          # (Cin_p, TT+256)

        # ---- block1: Conv1d(k=3, pad=1) as ONE K=3*Cin matmul on window cols 1..TT+2
        x3 = jnp.concatenate([xcat[:, 126:TT + 128],
                              xcat[:, 127:TT + 129],
                              xcat[:, 128:TT + 130]], axis=0)  # (3*Cin_p, TT+2)
        h = jnp.dot(w1_ref[...], x3, preferred_element_type=f32) + b1
        h = _rmsnorm_ct(h, g1, cout_real)
        h = _silu(h)

        # time-emb add + single fused mask multiply:
        # (silu*m + temb)*m == (silu + temb)*m because the mask is 0/1.
        m1 = m[:, 1:TT + 3].astype(f32)
        hm = ((h + temb) * m1).astype(cdt)                     # (Cout_p, TT+2)
        # TODO(synk): dropout is a no-op here (inference); training needs pltpu.prng_*.

        # ---- block2 on the central TT columns
        h3 = jnp.concatenate([hm[:, 0:TT], hm[:, 1:TT + 1], hm[:, 2:TT + 2]], axis=0)
        h2 = jnp.dot(w2_ref[...], h3, preferred_element_type=f32) + b2
        h2 = _rmsnorm_ct(h2, g2, cout_real)
        h2 = _silu(h2)
        h2 = h2 * m_c.astype(f32)

        # ---- residual: 1x1 conv, or Identity when dim_in == dim_out
        if use_res_conv:
            res = jnp.dot(wr_ref[...], xm, preferred_element_type=f32) + cp_ref[:, 4:5]
        else:
            res = xm                        # upcast happens in the add below

        # Output already in NCL orientation: (Cout_p, TT), lane-dense store.
        o_ref[0] = (h2 + res).astype(o_ref.dtype)

    return kernel


def resnet_block1d(x_ncl, mask_b1l, t_emb, params, *, t_tile=512,
                   compute_dtype=jnp.bfloat16, out_dtype=None):
    """x_ncl: (B, Cin, T), mask_b1l: (B, 1, T), t_emb: (B, Temb) -> (B, Cout, T).

    params: w1 (3,Cin,Cout), b1/g1 (1,Cout), w2 (3,Cout,Cout), b2/g2 (1,Cout),
            wm (Temb,Cout), bm (1,Cout), optional wr (Cin,Cout) / br (1,Cout)
            (omit wr/br for the Identity residual when dim_in == dim_out).
    """
    B, Cin, T = x_ncl.shape
    Cout = params["w1"].shape[-1]
    use_res_conv = params.get("wr", None) is not None
    if not use_res_conv and Cin != Cout:
        raise ValueError("Identity residual requires dim_in == dim_out")

    f32 = jnp.float32
    cdt = compute_dtype
    odt = x_ncl.dtype if out_dtype is None else out_dtype
    cin_p = _round_up(Cin, 16)      # sublane (and bf16-packing) aligned channels
    cout_p = _round_up(Cout, 16)

    # ---- time tiling: lane-dense (multiple of 128), balanced across n_t tiles.
    tt_cap = max(128, 128 * (t_tile // 128))
    n_t = max(1, -(-T // tt_cap))                  # ceil(T / tt_cap)
    TT = _round_up(-(-T // n_t), 128)              # balanced, lane-aligned tile
    T_pad = n_t * TT

    # ---- main input stays in padded NCL; no halo-window materialization in HBM.
    x_p = jnp.pad(x_ncl.astype(cdt), ((0, 0), (0, cin_p - Cin), (0, T_pad - T)))
    m_p = jnp.pad(mask_b1l.astype(cdt), ((0, 0), (0, 0), (0, T_pad - T)))

    # ---- tiny per-tile side inputs (negligible HBM traffic):
    #      window mask (1, TT+4) and the 4 mask-multiplied halo columns of x.
    widx = (jnp.arange(n_t, dtype=jnp.int32)[:, None] * TT
            + jnp.arange(TT + 4, dtype=jnp.int32)[None, :] - 2)       # (n_t, TT+4)
    wok = ((widx >= 0) & (widx < T_pad)).astype(cdt)
    m_win = jnp.take(m_p, jnp.clip(widx, 0, T_pad - 1), axis=2) * wok[None, None]
    m_win = jnp.transpose(m_win, (0, 2, 1, 3))                        # (B, n_t, 1, TT+4)

    hidx = (jnp.arange(n_t, dtype=jnp.int32)[:, None] * TT
            + jnp.array([-2, -1, TT, TT + 1], dtype=jnp.int32)[None, :])  # (n_t, 4)
    hok = ((hidx >= 0) & (hidx < T_pad)).astype(cdt)
    hidx_c = jnp.clip(hidx, 0, T_pad - 1)
    x_halo = (jnp.take(x_p, hidx_c, axis=2) * jnp.take(m_p, hidx_c, axis=2)
              * hok[None, None])
    x_halo = jnp.transpose(x_halo, (0, 2, 1, 3))                      # (B, n_t, cin_p, 4)

    # ---- hoisted time-embedding MLP: SiLU -> Linear (M=1 matmul; done once in XLA).
    temb = _silu(t_emb.astype(f32)) @ params["wm"].astype(f32) \
        + params["bm"].astype(f32).reshape(1, -1)                     # (B, Cout)
    temb = jnp.pad(temb, ((0, 0), (0, cout_p - Cout)))[:, :, None]    # (B, Cout_p, 1)

    # ---- weights: fuse the 3 conv taps -> (Cout_p, 3*C_p) matrices for one matmul.
    def fuse_conv_w(w, cip, cop):
        w = jnp.pad(w.astype(cdt),
                    ((0, 0), (0, cip - w.shape[1]), (0, cop - w.shape[2])))
        return jnp.transpose(w, (2, 0, 1)).reshape(cop, 3 * cip)      # [o, k*cip + i]

    w1 = fuse_conv_w(params["w1"], cin_p, cout_p)                     # (Cout_p, 3*Cin_p)
    w2 = fuse_conv_w(params["w2"], cout_p, cout_p)                    # (Cout_p, 3*Cout_p)

    # ---- pack the per-channel column params into one (Cout_p, 8) array:
    #      cols = [b1, g1, b2, g2, br, 0, 0, 0]
    def col(v):
        return jnp.pad(v.astype(f32).reshape(-1), (0, cout_p - Cout))
    cols = [col(params["b1"]), col(params["g1"]),
            col(params["b2"]), col(params["g2"]),
            col(params["br"]) if use_res_conv else jnp.zeros((cout_p,), f32)]
    cols += [jnp.zeros((cout_p,), f32)] * (8 - len(cols))
    cpack = jnp.stack(cols, axis=1)                                   # (Cout_p, 8)

    def const_spec(shape):
        return pl.BlockSpec(shape, lambda b, j, _n=len(shape): (0,) * _n)

    in_specs = [
        pl.BlockSpec((1, cin_p, TT), lambda b, j: (b, 0, j)),
        pl.BlockSpec((1, 1, cin_p, 4), lambda b, j: (b, j, 0, 0)),
        pl.BlockSpec((1, 1, 1, TT + 4), lambda b, j: (b, j, 0, 0)),
        pl.BlockSpec((1, cout_p, 1), lambda b, j: (b, 0, 0)),
        const_spec((cout_p, 3 * cin_p)),
        const_spec((cout_p, 3 * cout_p)),
        const_spec((cout_p, 8)),
    ]
    args = [x_p, x_halo, m_win, temb, w1, w2, cpack]
    if use_res_conv:
        wr = jnp.transpose(jnp.pad(params["wr"].astype(cdt),
                                   ((0, cin_p - Cin), (0, cout_p - Cout))))
        in_specs.append(const_spec((cout_p, cin_p)))
        args.append(wr)

    kernel = _make_kernel(TT, Cout, use_res_conv)

    out_pad = pl.pallas_call(
        kernel,
        out_shape=jax.ShapeDtypeStruct((B, cout_p, T_pad), odt),
        grid_spec=pltpu.PrefetchScalarGridSpec(
            num_scalar_prefetch=0,
            grid=(B, n_t),
            in_specs=in_specs,
            out_specs=pl.BlockSpec((1, cout_p, TT), lambda b, j: (b, 0, j)),
        ),
        compiler_params=pltpu.CompilerParams(
            dimension_semantics=("parallel", "parallel")),
    )(*args)

    return out_pad[:, :Cout, :T]   # output is already NCL: (B, Cout, T)


# ---------------- pure-JAX reference (for correctness check) ----------------
def _ref_conv1d(x_ncl, w_kic, b):
    w_oik = jnp.transpose(w_kic, (2, 1, 0))    # (Cout, Cin, K)
    y = jax.lax.conv_general_dilated(
        x_ncl, w_oik, window_strides=(1,), padding=((1, 1),),
        dimension_numbers=("NCH", "OIH", "NCH"))
    return y + b.reshape(1, -1, 1)


def ref_forward(x, mask, t, p):
    def rms_nct(h, g):
        hc = jnp.transpose(h, (0, 2, 1))
        out = hc * jax.lax.rsqrt(jnp.mean(hc * hc, -1, keepdims=True) + EPS) * g.reshape(1, 1, -1)
        return jnp.transpose(out, (0, 2, 1))

    def block(xin, w, b, g):
        h = _ref_conv1d(xin * mask, w, b)
        h = rms_nct(h, g)
        h = _silu(h)
        return h * mask

    h = block(x, p["w1"], p["b1"], p["g1"])
    temb = _silu(t) @ p["wm"] + p["bm"][0]
    h = h + temb[:, :, None]
    h = block(h, p["w2"], p["b2"], p["g2"])
    if p.get("wr", None) is not None:
        res = jnp.einsum("bct,co->bot", x * mask, p["wr"]) + p["br"][0][None, :, None]
    else:
        res = x * mask
    return h + res


def _make_params(key, Cin, Cout, Temb, with_res):
    ks = jax.random.split(key, 10)
    s = 0.1
    p = dict(
        w1=s * jax.random.normal(ks[0], (3, Cin, Cout), jnp.float32),
        b1=s * jax.random.normal(ks[1], (1, Cout), jnp.float32),
        g1=1.0 + s * jax.random.normal(ks[2], (1, Cout), jnp.float32),
        w2=s * jax.random.normal(ks[3], (3, Cout, Cout), jnp.float32),
        b2=s * jax.random.normal(ks[4], (1, Cout), jnp.float32),
        g2=1.0 + s * jax.random.normal(ks[5], (1, Cout), jnp.float32),
        wm=s * jax.random.normal(ks[6], (Temb, Cout), jnp.float32),
        bm=s * jax.random.normal(ks[7], (1, Cout), jnp.float32),
    )
    if with_res:
        p["wr"] = s * jax.random.normal(ks[8], (Cin, Cout), jnp.float32)
        p["br"] = s * jax.random.normal(ks[9], (1, Cout), jnp.float32)
    return p


if __name__ == "__main__":
    key = jax.random.PRNGKey(0)
    k1, k2, k3, k4, k5 = jax.random.split(key, 5)

    # ---- test 1: dim_in != dim_out (1x1 res conv), single time tile -----------------
    B, Cin, Cout, T, Temb = 2, 4, 8, 16, 32
    x = jax.random.normal(k1, (B, Cin, T), jnp.float32)
    lens = jnp.array([T, 11])
    mask = (jnp.arange(T)[None, :] < lens[:, None]).astype(jnp.float32)[:, None, :]
    t = jax.random.normal(k2, (B, Temb), jnp.float32)
    params = _make_params(k3, Cin, Cout, Temb, with_res=True)

    ref = ref_forward(x, mask, t, params)

    out_f32 = jax.block_until_ready(
        resnet_block1d(x, mask, t, params, compute_dtype=jnp.float32))
    assert out_f32.shape == (B, Cout, T), out_f32.shape
    err = float(jnp.max(jnp.abs(out_f32 - ref)))
    assert err < 1e-3, f"f32 path mismatch: {err}"

    # bf16 MXU operands / f32 accumulation (the performance configuration)
    out_bf16 = jax.block_until_ready(resnet_block1d(x, mask, t, params))
    err_bf = float(jnp.max(jnp.abs(out_bf16 - ref)))
    assert err_bf < 0.25, f"bf16 path sanity check failed: {err_bf}"

    # ---- test 2: dim_in == dim_out (Identity residual), multiple time tiles + halos --
    B2, C2, T2 = 2, 8, 320
    x2 = jax.random.normal(k4, (B2, C2, T2), jnp.float32)
    lens2 = jnp.array([T2, 201])
    mask2 = (jnp.arange(T2)[None, :] < lens2[:, None]).astype(jnp.float32)[:, None, :]
    t2 = jax.random.normal(k5, (B2, Temb), jnp.float32)
    params2 = _make_params(k3, C2, C2, Temb, with_res=False)

    ref2 = ref_forward(x2, mask2, t2, params2)
    out2 = jax.block_until_ready(
        resnet_block1d(x2, mask2, t2, params2, t_tile=128, compute_dtype=jnp.float32))
    assert out2.shape == (B2, C2, T2), out2.shape
    err2 = float(jnp.max(jnp.abs(out2 - ref2)))
    assert err2 < 1e-3, f"multi-tile f32 path mismatch: {err2}"

    print("KERNEL_OK")
</pallas_src>

<mosaic_0001>
module attributes {stable_mosaic.version = 11 : i64} {
  func.func @kernel(%arg0: i32, %arg1: i32, %arg2: memref<1x16x128xf32, #tpu.memory_space<vmem>>, %arg3: memref<1x1x16x4xf32, #tpu.memory_space<vmem>>, %arg4: memref<1x1x1x132xf32, #tpu.memory_space<vmem>>, %arg5: memref<1x16x1xf32, #tpu.memory_space<vmem>>, %arg6: memref<16x48xf32, #tpu.memory_space<vmem>>, %arg7: memref<16x48xf32, #tpu.memory_space<vmem>>, %arg8: memref<16x8xf32, #tpu.memory_space<vmem>>, %arg9: memref<16x16xf32, #tpu.memory_space<vmem>>, %arg10: memref<1x16x128xf32, #tpu.memory_space<vmem>>) attributes {dimension_semantics = [#tpu.dimension_semantics<parallel>, #tpu.dimension_semantics<parallel>], iteration_bounds = array<i64: 2, 1>, scalar_prefetch = 0 : i64, scratch_operands = 0 : i64, tpu.core_type = #tpu.core_type<tc>, window_params = [{transform_indices = @transform_0, window_bounds = array<i64: 1, 16, 128>}, {transform_indices = @transform_1, window_bounds = array<i64: 1, 1, 16, 4>}, {transform_indices = @transform_2, window_bounds = array<i64: 1, 1, 1, 132>}, {transform_indices = @transform_3, window_bounds = array<i64: 1, 16, 1>}, {pipeline_mode = #tpu.pipeline_mode<synchronous>, transform_indices = @transform_4, window_bounds = array<i64: 16, 48>}, {pipeline_mode = #tpu.pipeline_mode<synchronous>, transform_indices = @transform_5, window_bounds = array<i64: 16, 48>}, {pipeline_mode = #tpu.pipeline_mode<synchronous>, transform_indices = @transform_6, window_bounds = array<i64: 16, 8>}, {pipeline_mode = #tpu.pipeline_mode<synchronous>, transform_indices = @transform_7, window_bounds = array<i64: 16, 16>}, {transform_indices = @transform_8, window_bounds = array<i64: 1, 16, 128>}]} {
    %c0 = arith.constant 0 : index
    %c0_0 = arith.constant 0 : index
    %c0_1 = arith.constant 0 : index
    %0 = vector.load %arg2[%c0, %c0_0, %c0_1] : memref<1x16x128xf32, #tpu.memory_space<vmem>>, vector<1x16x128xf32>
    %1 = vector.shape_cast %0 : vector<1x16x128xf32> to vector<16x128xf32>
    %c0_2 = arith.constant 0 : index
    %c0_3 = arith.constant 0 : index
    %c0_4 = arith.constant 0 : index
    %c0_5 = arith.constant 0 : index
    %2 = vector.load %arg3[%c0_2, %c0_3, %c0_4, %c0_5] : memref<1x1x16x4xf32, #tpu.memory_space<vmem>>, vector<1x1x16x4xf32>
    %3 = vector.shape_cast %2 : vector<1x1x16x4xf32> to vector<16x4xf32>
    %c0_6 = arith.constant 0 : index
    %c0_7 = arith.constant 0 : index
    %c0_8 = arith.constant 0 : index
    %c0_9 = arith.constant 0 : index
    %4 = vector.load %arg4[%c0_6, %c0_7, %c0_8, %c0_9] : memref<1x1x1x132xf32, #tpu.memory_space<vmem>>, vector<1x1x1x132xf32>
    %5 = vector.shape_cast %4 : vector<1x1x1x132xf32> to vector<1x132xf32>
    %c0_10 = arith.constant 0 : index
    %c0_11 = arith.constant 0 : index
    %c0_12 = arith.constant 0 : index
    %6 = vector.load %arg5[%c0_10, %c0_11, %c0_12] : memref<1x16x1xf32, #tpu.memory_space<vmem>>, vector<1x16x1xf32>
    %7 = vector.shape_cast %6 : vector<1x16x1xf32> to vector<16x1xf32>
    %c0_13 = arith.constant 0 : index
    %c0_14 = arith.constant 0 : index
    %8 = vector.load %arg8[%c0_13, %c0_14] : memref<16x8xf32, #tpu.memory_space<vmem>>, vector<16x1xf32>
    %c0_15 = arith.constant 0 : index
    %c1 = arith.constant 1 : index
    %9 = vector.load %arg8[%c0_15, %c1] : memref<16x8xf32, #tpu.memory_space<vmem>>, vector<16x1xf32>
    %c0_16 = arith.constant 0 : index
    %c2 = arith.constant 2 : index
    %10 = vector.load %arg8[%c0_16, %c2] : memref<16x8xf32, #tpu.memory_space<vmem>>, vector<16x1xf32>
    %c0_17 = arith.constant 0 : index
    %c3 = arith.constant 3 : index
    %11 = vector.load %arg8[%c0_17, %c3] : memref<16x8xf32, #tpu.memory_space<vmem>>, vector<16x1xf32>
    %12 = vector.extract_strided_slice %5 {offsets = [0, 2], sizes = [1, 128], strides = [1, 1]} : vector<1x132xf32> to vector<1x128xf32>
    %13 = vector.broadcast %12 : vector<1x128xf32> to vector<16x128xf32>
    %14 = arith.mulf %1, %13 : vector<16x128xf32>
    %15 = tpu.iota {dimensions = array<i32: 1>} : vector<1x128xi32>
    %c126_i32 = arith.constant 126 : i32
    %16 = vector.broadcast %c126_i32 : i32 to vector<1x128xi32>
    %17 = arith.cmpi eq, %15, %16 : vector<1x128xi32>
    %18 = vector.extract_strided_slice %3 {offsets = [0, 0], sizes = [16, 1], strides = [1, 1]} : vector<16x4xf32> to vector<16x1xf32>
    %c0_i32 = arith.constant 0 : i32
    %19 = arith.sitofp %c0_i32 : i32 to f32
    %20 = vector.shape_cast %17 : vector<1x128xi1> to vector<1x128xi1>
    %21 = vector.broadcast %20 : vector<1x128xi1> to vector<16x128xi1>
    %22 = vector.shape_cast %18 : vector<16x1xf32> to vector<16x1xf32>
    %23 = vector.broadcast %22 : vector<16x1xf32> to vector<16x128xf32>
    %24 = vector.broadcast %19 : f32 to vector<16x128xf32>
    %25 = arith.select %21, %23, %24 : vector<16x128xi1>, vector<16x128xf32>
    %c127_i32 = arith.constant 127 : i32
    %26 = vector.broadcast %c127_i32 : i32 to vector<1x128xi32>
    %27 = arith.cmpi eq, %15, %26 : vector<1x128xi32>
    %28 = vector.extract_strided_slice %3 {offsets = [0, 1], sizes = [16, 1], strides = [1, 1]} : vector<16x4xf32> to vector<16x1xf32>
    %c0_i32_18 = arith.constant 0 : i32
    %29 = arith.sitofp %c0_i32_18 : i32 to f32
    %30 = vector.shape_cast %27 : vector<1x128xi1> to vector<1x128xi1>
    %31 = vector.broadcast %30 : vector<1x128xi1> to vector<16x128xi1>
    %32 = vector.shape_cast %28 : vector<16x1xf32> to vector<16x1xf32>
    %33 = vector.broadcast %32 : vector<16x1xf32> to vector<16x128xf32>
    %34 = vector.broadcast %29 : f32 to vector<16x128xf32>
    %35 = arith.select %31, %33, %34 : vector<16x128xi1>, vector<16x128xf32>
    %36 = arith.addf %25, %35 : vector<16x128xf32>
    %c0_i32_19 = arith.constant 0 : i32
    %37 = vector.broadcast %c0_i32_19 : i32 to vector<1x128xi32>
    %38 = arith.cmpi eq, %15, %37 : vector<1x128xi32>
    %39 = vector.extract_strided_slice %3 {offsets = [0, 2], sizes = [16, 1], strides = [1, 1]} : vector<16x4xf32> to vector<16x1xf32>
    %c0_i32_20 = arith.constant 0 : i32
    %40 = arith.sitofp %c0_i32_20 : i32 to f32
    %41 = vector.shape_cast %38 : vector<1x128xi1> to vector<1x128xi1>
    %42 = vector.broadcast %41 : vector<1x128xi1> to vector<16x128xi1>
    %43 = vector.shape_cast %39 : vector<16x1xf32> to vector<16x1xf32>
    %44 = vector.broadcast %43 : vector<16x1xf32> to vector<16x128xf32>
    %45 = vector.broadcast %40 : f32 to vector<16x128xf32>
    %46 = arith.select %42, %44, %45 : vector<16x128xi1>, vector<16x128xf32>
    %c1_i32 = arith.constant 1 : i32
    %47 = vector.broadcast %c1_i32 : i32 to vector<1x128xi32>
    %48 = arith.cmpi eq, %15, %47 : vector<1x128xi32>
    %49 = vector.extract_strided_slice %3 {offsets = [0, 3], sizes = [16, 1], strides = [1, 1]} : vector<16x4xf32> to vector<16x1xf32>
    %c0_i32_21 = arith.constant 0 : i32
    %50 = arith.sitofp %c0_i32_21 : i32 to f32
    %51 = vector.shape_cast %48 : vector<1x128xi1> to vector<1x128xi1>
    %52 = vector.broadcast %51 : vector<1x128xi1> to vector<16x128xi1>
    %53 = vector.shape_cast %49 : vector<16x1xf32> to vector<16x1xf32>
    %54 = vector.broadcast %53 : vector<16x1xf32> to vector<16x128xf32>
    %55 = vector.broadcast %50 : f32 to vector<16x128xf32>
    %56 = arith.select %52, %54, %55 : vector<16x128xi1>, vector<16x128xf32>
    %57 = arith.addf %46, %56 : vector<16x128xf32>
    %58 = tpu.concatenate %36, %14, %57 in 1 : vector<16x128xf32>, vector<16x128xf32>, vector<16x128xf32> -> vector<16x384xf32>
    %59 = vector.extract_strided_slice %58 {offsets = [0, 126], sizes = [16, 130], strides = [1, 1]} : vector<16x384xf32> to vector<16x130xf32>
    %60 = vector.extract_strided_slice %58 {offsets = [0, 127], sizes = [16, 130], strides = [1, 1]} : vector<16x384xf32> to vector<16x130xf32>
    %61 = vector.extract_strided_slice %58 {offsets = [0, 128], sizes = [16, 130], strides = [1, 1]} : vector<16x384xf32> to vector<16x130xf32>
    %62 = tpu.concatenate %59, %60, %61 in 0 : vector<16x130xf32>, vector<16x130xf32>, vector<16x130xf32> -> vector<48x130xf32>
    %c0_22 = arith.constant 0 : index
    %c0_23 = arith.constant 0 : index
    %63 = vector.load %arg6[%c0_22, %c0_23] : memref<16x48xf32, #tpu.memory_space<vmem>>, vector<16x48xf32>
    %cst = arith.constant dense<0.000000e+00> : vector<16x130xf32>
    %64 = tpu.matmul %63, %62, %cst {dimension_numbers = #tpu.dot_dimension_numbers<[1], [0], [0], [1], [0, 0, 1, 1], [], []>} : vector<16x48xf32>, vector<48x130xf32>, vector<16x130xf32> -> vector<16x130xf32>
    %65 = vector.broadcast %8 : vector<16x1xf32> to vector<16x130xf32>
    %66 = arith.addf %64, %65 : vector<16x130xf32>
    %67 = arith.mulf %66, %66 : vector<16x130xf32>
    %cst_24 = arith.constant dense<0.000000e+00> : vector<130xf32>
    %68 = vector.multi_reduction <add>, %67, %cst_24 [0] : vector<16x130xf32> to vector<130xf32>
    %69 = vector.shape_cast %68 : vector<130xf32> to vector<1x130xf32>
    %cst_25 = arith.constant 1.250000e-01 : f32
    %70 = vector.broadcast %cst_25 : f32 to vector<1x130xf32>
    %71 = arith.mulf %69, %70 : vector<1x130xf32>
    %cst_26 = arith.constant 9.99999997E-7 : f32
    %72 = vector.broadcast %cst_26 : f32 to vector<1x130xf32>
    %73 = arith.addf %71, %72 : vector<1x130xf32>
    %74 = math.rsqrt %73 : vector<1x130xf32>
    %75 = vector.broadcast %74 : vector<1x130xf32> to vector<16x130xf32>
    %76 = arith.mulf %66, %75 : vector<16x130xf32>
    %77 = vector.broadcast %9 : vector<16x1xf32> to vector<16x130xf32>
    %78 = arith.mulf %76, %77 : vector<16x130xf32>
    %79 = arith.negf %78 : vector<16x130xf32>
    %80 = math.exp %79 : vector<16x130xf32>
    %cst_27 = arith.constant 1.000000e+00 : f32
    %81 = vector.broadcast %cst_27 : f32 to vector<16x130xf32>
    %82 = arith.addf %81, %80 : vector<16x130xf32>
    %83 = arith.divf %81, %82 : vector<16x130xf32>
    %84 = arith.mulf %78, %83 : vector<16x130xf32>
    %85 = vector.extract_strided_slice %5 {offsets = [0, 1], sizes = [1, 130], strides = [1, 1]} : vector<1x132xf32> to vector<1x130xf32>
    %86 = vector.broadcast %7 : vector<16x1xf32> to vector<16x130xf32>
    %87 = arith.addf %84, %86 : vector<16x130xf32>
    %88 = vector.broadcast %85 : vector<1x130xf32> to vector<16x130xf32>
    %89 = arith.mulf %87, %88 : vector<16x130xf32>
    %90 = vector.extract_strided_slice %89 {offsets = [0, 0], sizes = [16, 128], strides = [1, 1]} : vector<16x130xf32> to vector<16x128xf32>
    %91 = vector.extract_strided_slice %89 {offsets = [0, 1], sizes = [16, 128], strides = [1, 1]} : vector<16x130xf32> to vector<16x128xf32>
    %92 = vector.extract_strided_slice %89 {offsets = [0, 2], sizes = [16, 128], strides = [1, 1]} : vector<16x130xf32> to vector<16x128xf32>
    %93 = tpu.concatenate %90, %91, %92 in 0 : vector<16x128xf32>, vector<16x128xf32>, vector<16x128xf32> -> vector<48x128xf32>
    %c0_28 = arith.constant 0 : index
    %c0_29 = arith.constant 0 : index
    %94 = vector.load %arg7[%c0_28, %c0_29] : memref<16x48xf32, #tpu.memory_space<vmem>>, vector<16x48xf32>
    %cst_30 = arith.constant dense<0.000000e+00> : vector<16x128xf32>
    %95 = tpu.matmul %94, %93, %cst_30 {dimension_numbers = #tpu.dot_dimension_numbers<[1], [0], [0], [1], [0, 0, 1, 1], [], []>} : vector<16x48xf32>, vector<48x128xf32>, vector<16x128xf32> -> vector<16x128xf32>
    %96 = vector.broadcast %10 : vector<16x1xf32> to vector<16x128xf32>
    %97 = arith.addf %95, %96 : vector<16x128xf32>
    %98 = arith.mulf %97, %97 : vector<16x128xf32>
    %cst_31 = arith.constant dense<0.000000e+00> : vector<128xf32>
    %99 = vector.multi_reduction <add>, %98, %cst_31 [0] : vector<16x128xf32> to vector<128xf32>
    %100 = vector.shape_cast %99 : vector<128xf32> to vector<1x128xf32>
    %cst_32 = arith.constant 1.250000e-01 : f32
    %101 = vector.broadcast %cst_32 : f32 to vector<1x128xf32>
    %102 = arith.mulf %100, %101 : vector<1x128xf32>
    %cst_33 = arith.constant 9.99999997E-7 : f32
    %103 = vector.broadcast %cst_33 : f32 to vector<1x128xf32>
    %104 = arith.addf %102, %103 : vector<1x128xf32>
    %105 = math.rsqrt %104 : vector<1x128xf32>
    %106 = vector.broadcast %105 : vector<1x128xf32> to vector<16x128xf32>
    %107 = arith.mulf %97, %106 : vector<16x128xf32>
    %108 = vector.broadcast %11 : vector<16x1xf32> to vector<16x128xf32>
    %109 = arith.mulf %107, %108 : vector<16x128xf32>
    %110 = arith.negf %109 : vector<16x128xf32>
    %111 = math.exp %110 : vector<16x128xf32>
    %cst_34 = arith.constant 1.000000e+00 : f32
    %112 = vector.broadcast %cst_34 : f32 to vector<16x128xf32>
    %113 = arith.addf %112, %111 : vector<16x128xf32>
    %114 = arith.divf %112, %113 : vector<16x128xf32>
    %115 = arith.mulf %109, %114 : vector<16x128xf32>
    %116 = vector.broadcast %12 : vector<1x128xf32> to vector<16x128xf32>
    %117 = arith.mulf %115, %116 : vector<16x128xf32>
    %c0_35 = arith.constant 0 : index
    %c0_36 = arith.constant 0 : index
    %118 = vector.load %arg9[%c0_35, %c0_36] : memref<16x16xf32, #tpu.memory_space<vmem>>, vector<16x16xf32>
    %cst_37 = arith.constant dense<0.000000e+00> : vector<16x128xf32>
    %119 = tpu.matmul %118, %14, %cst_37 {dimension_numbers = #tpu.dot_dimension_numbers<[1], [0], [0], [1], [0, 0, 1, 1], [], []>} : vector<16x16xf32>, vector<16x128xf32>, vector<16x128xf32> -> vector<16x128xf32>
    %c0_38 = arith.constant 0 : index
    %c4 = arith.constant 4 : index
    %120 = vector.load %arg8[%c0_38, %c4] : memref<16x8xf32, #tpu.memory_space<vmem>>, vector<16x1xf32>
    %121 = vector.broadcast %120 : vector<16x1xf32> to vector<16x128xf32>
    %122 = arith.addf %119, %121 : vector<16x128xf32>
    %123 = arith.addf %117, %122 : vector<16x128xf32>
    %c0_39 = arith.constant 0 : index
    %c0_40 = arith.constant 0 : index
    %c0_41 = arith.constant 0 : index
    %124 = vector.load %arg10[%c0_39, %c0_40, %c0_41] : memref<1x16x128xf32, #tpu.memory_space<vmem>>, vector<1x16x128xf32>
    %125 = vector.shape_cast %124 : vector<1x16x128xf32> to vector<16x128xf32>
    %126 = vector.shape_cast %123 : vector<16x128xf32> to vector<1x16x128xf32>
    tpu.vector_store %arg10[%c0_39, %c0_40, %c0_41], %126 {strides = array<i32>} : memref<1x16x128xf32, #tpu.memory_space<vmem>>, vector<1x16x128xf32>,
    return
  }
  func.func @transform_0(%arg0: i32, %arg1: i32) -> (i32, i32, i32) {
    %c0_i32 = arith.constant 0 : i32
    %c0_i32_0 = arith.constant 0 : i32
    return %arg0, %c0_i32, %arg1 : i32, i32, i32
  }
  func.func @transform_1(%arg0: i32, %arg1: i32) -> (i32, i32, i32, i32) {
    %c0_i32 = arith.constant 0 : i32
    %c0_i32_0 = arith.constant 0 : i32
    %c0_i32_1 = arith.constant 0 : i32
    return %arg0, %arg1, %c0_i32, %c0_i32_0 : i32, i32, i32, i32
  }
  func.func @transform_2(%arg0: i32, %arg1: i32) -> (i32, i32, i32, i32) {
    %c0_i32 = arith.constant 0 : i32
    %c0_i32_0 = arith.constant 0 : i32
    %c0_i32_1 = arith.constant 0 : i32
    return %arg0, %arg1, %c0_i32, %c0_i32_0 : i32, i32, i32, i32
  }
  func.func @transform_3(%arg0: i32, %arg1: i32) -> (i32, i32, i32) {
    %c0_i32 = arith.constant 0 : i32
    %c0_i32_0 = arith.constant 0 : i32
    %c0_i32_1 = arith.constant 0 : i32
    return %arg0, %c0_i32, %c0_i32_0 : i32, i32, i32
  }
  func.func @transform_4(%arg0: i32, %arg1: i32) -> (i32, i32) {
    %c0_i32 = arith.constant 0 : i32
    %c0_i32_0 = arith.constant 0 : i32
    %c0_i32_1 = arith.constant 0 : i32
    return %c0_i32, %c0_i32_0 : i32, i32
  }
  func.func @transform_5(%arg0: i32, %arg1: i32) -> (i32, i32) {
    %c0_i32 = arith.constant 0 : i32
    %c0_i32_0 = arith.constant 0 : i32
    %c0_i32_1 = arith.constant 0 : i32
    return %c0_i32, %c0_i32_0 : i32, i32
  }
  func.func @transform_6(%arg0: i32, %arg1: i32) -> (i32, i32) {
    %c0_i32 = arith.constant 0 : i32
    %c0_i32_0 = arith.constant 0 : i32
    %c0_i32_1 = arith.constant 0 : i32
    return %c0_i32, %c0_i32_0 : i32, i32
  }
  func.func @transform_7(%arg0: i32, %arg1: i32) -> (i32, i32) {
    %c0_i32 = arith.constant 0 : i32
    %c0_i32_0 = arith.constant 0 : i32
    %c0_i32_1 = arith.constant 0 : i32
    return %c0_i32, %c0_i32_0 : i32, i32
  }
  func.func @transform_8(%arg0: i32, %arg1: i32) -> (i32, i32, i32) {
    %c0_i32 = arith.constant 0 : i32
    %c0_i32_0 = arith.constant 0 : i32
    return %arg0, %c0_i32, %arg1 : i32, i32, i32
  }
}

</mosaic_0001>

<bundles_post_ra>
// kernel: tpu_custom_call.1
= control target key start
LH: loop header
LB: loop body
LE: loop exit
PB: predicated region body
PF: predicated region fallthrough
CT: control target
= control target key end

     0   :  { %13 = vsyncpa [#allocation3], 0  ;;  %s1839_s0 = inlined_call_operand.vmem [shape: f32[2,16,128], index: 0, kind: input, shape index: {}]   ;;  %s1840_s1 = inlined_call_operand.vmem [shape: f32[2,1,16,4], index: 1, kind: input, shape index: {}]   ;;  %s1841_s2 = inlined_call_operand.vmem [shape: f32[2,1,1,132], index: 2, kind: input, shape index: {}]   ;;  %s1842_s3 = inlined_call_operand.vmem [shape: f32[2,16,1], index: 3, kind: input, shape index: {}]   ;;  %s1843_s4 = inlined_call_operand.vmem [shape: f32[16,48], index: 4, kind: input, shape index: {}]   ;;  %s1844_s5 = inlined_call_operand.vmem [shape: f32[16,48], index: 5, kind: input, shape index: {}]   ;;  %s1845_s6 = inlined_call_operand.vmem [shape: f32[16,8], index: 6, kind: input, shape index: {}]   ;;  %s1846_s7 = inlined_call_operand.vmem [shape: f32[16,16], index: 7, kind: input, shape index: {}]   ;;  %s1847_s8 = inlined_call_operand.hbm [shape: f32[2,16,128], index: 8, kind: output, shape index: {}]  }
   0x1   :  { %15 = vsyncpa [#allocation3 + $0x1], 0  ;;  %s1587_s27 = smov 0   ;;  %s1589_s28 = smov 0  }
   0x2   :  { %s1591_s29 = smov 0   ;;  %s1593_s30 = smov 0  }
   0x3   :  { %s1595_s9 = smov 0   ;;  %s1597_s10 = smov 0  }
   0x4 LB: > { %s1167_s11 = sadd.s32 4294967295, %s1528_s10   ;;  %s1168_s12 = sadd.s32 4294967294, %s1528_s10   ;;  %s1528_s10 = sphi %s1597_s10, %s21_s10   ;;  %s1524_s9 = sphi %s1595_s9, %s1854_s9   ;;  %s1520_s30 = sphi %s1593_s30, %s1853_s30   ;;  %s1516_s29 = sphi %s1591_s29, %s1852_s29   ;;  %s1512_s28 = sphi %s1589_s28, %s1851_s28   ;;  %s1508_s27 = sphi %s1587_s27, %s1850_s27  }
   0x5   : > { %s33_s13 = sadd.s32 1, %s1524_s9  ;;  %s236_s14 = sadd.s32 1, %s1516_s29 }
   0x6   : > { %p35_p0 = scmp.ge.s32.totalorder %s33_s13, 2  ;;  %p246_p1 = scmp.ne.s32.totalorder %s1516_s29, %s1512_s28 }
   0x7   : > { %p247_p2 = scmp.eq.s32.totalorder %s1167_s11, 1  ;;  %p252_p3 = scmp.ne.s32.totalorder %s1512_s28, %s1508_s27 }
   0x8   : > { %s1856_s13 = smov (%p35_p0, %s33_s13), 0  ;;  %p253_p5 = scmp.eq.s32.totalorder %s1168_s12, 1 }
   0x9   : > { %p1627_p4 = por %p247_p2, %p246_p1  ;;  %s231_s16 = ssub.s32 %s1524_s9, %s1856_s13 }
   0xa   : > { %p1171_p6 = scmp.ge.s32.totalorder %s1528_s10, 1  ;;  %p234_p7 = scmp.eq.s32.totalorder %s231_s16, 0 }
   0xb   : > { %p1634_p8 = por %p253_p5, %p252_p3  ;;  %p325_p9 = scmp.lt.s32.totalorder %s1528_s10, 3 }
   0xc   : > { %s1640_s18 = scalar_select %p234_p7, %s1516_s29, %s236_s14  }
   0xd   : > { %p326_p10 = pnand %p1171_p6, %p325_p9 }
   0xe   : > { %p384_p11 = scmp.lt.s32.totalorder (!%p326_p10), %s1520_s30, 1  ;;  %v1530_v0 = vmov (!%p326_p10), 1   ;;  %v1531_v1 = vmov (!%p326_p10), 0   ;;  %v424_v4 = vlaneseq (!%p326_p10)  ;;  %v1532_v6 = vmov (!%p326_p10), 2   ;;  %s1534_s12 = smov (!%p326_p10), 126  }
   0xf   : > { %329 = sbr.rel (%p326_p10) target bundleno = 1149 (0x47d), region = 52  ;;  %1330 = vset.pattern.permute.xlu1 (!%p326_p10), %v1530_v0  ;;  %1329 = vset.pattern.permute.xlu0 (!%p326_p10), %v1531_v1  ;;  %v1533_v9 = vmov (!%p326_p10), 3   ;;  %s1535_s21 = smov (!%p326_p10), 127   ;;  %vm436_vm4 = vcmask (!%p326_p10), 1031168   ;;  %vm519_vm5 = vcmask (!%p326_p10), 1039360   ;;  %vm570_vm6 = vcmask (!%p326_p10), 15360  }
  0x10   : > { %v425_v5 = vshrl.u32 (!%p326_p10), %v424_v4, 7  ;;  %v442_v16 = vand.u32 (!%p326_p10), 127, %v424_v4  ;;  %s1536_s22 = smov (!%p326_p10), 2   ;;  %vm589_vm7 = vcmask (!%p326_p10), 392192   ;;  %vm937_vm8 = vcmask (!%p326_p10), 130048  }
  0x12   : > { %v426_v7 = vsub.s32 (!%p326_p10), 0, %v425_v5  ;;  %v430_v11 = vsub.s32 (!%p326_p10), 1, %v425_v5  ;;  %vm458_vm0 = vcmp.eq.s32.totalorder (!%p326_p10), %v442_v16, 127  ;;  %vm443_vm1 = vcmp.eq.s32.totalorder (!%p326_p10), %v442_v16, 126 }
  0x13   : > { %vm473_vm2 = vcmp.eq.s32.totalorder (!%p326_p10), %v442_v16, 0  ;;  %vm486_vm3 = vcmp.eq.s32.totalorder (!%p326_p10), %v442_v16, 1 }
  0x16   : > { %s385_s19 = scalar_select %p384_p11, %s1520_s30, 1 }
  0x18   : > { %s1646_s20 = sshll.u32 %s385_s19, 4  ;;  %s1177_s24 = sshll.u32 %s385_s19, 1 }
  0x19   : > { %s400_s23 = scalar_lea.vmem %s1840_s1, %s1646_s20  ;;  %s408_s11 = scalar_lea.vmem %s1841_s2, %s1177_s24 }
  0x1a   : > { %v416_v2 = vld [vmem:[%s400_s23] sm:$0xff]  ;;  %v417_v3 = vld [vmem:[%s400_s23 + $0x8] sm:$0xff]  ;;  %s391_s19 = scalar_lea.vmem %s1839_s0, %s1646_s20  ;;  %s413_s16 = scalar_lea.vmem %s1842_s3, %s1646_s20 }
  0x1b   : > { %462 = vperm.xlu1 %1330, %v416_v2   ;;  %448 = vperm.xlu0 %1329, %v416_v2   ;;  %v418_v8 = vld [vmem:[%s408_s11] sm:$0x3]  ;;  %v415_v32 = vld [vmem:[%s391_s19 + $0x8] sm:$0xff]  ;;  %s381_s20 = sand.u32 1, %s1512_s28   ;;  %s1200_s24 = sshll.u32 %s1520_s30, 8 }
  0x1c   : > { %v1659_v10 = vrot.slane %v418_v8, %v426_v7  ;;  %v1663_v12 = vrot.slane %v418_v8, %v430_v11  ;;  %v414_v31 = vld [vmem:[%s391_s19] sm:$0xff]  ;;  %s1172_s19 = sshll.u32 %s381_s20, 4  ;;  %s1793_s30 = scalar_lea.sflag [#allocation3], %s381_s20 }
  0x1d   : > { %s1539_s11 = smov [#allocation2]  }
  0x1e   : > { %s1454_s14 = sshll.u32 %s1539_s11, 4  ;;  %s1455_s14 = int_to_ptr.vmem [resolvable:$false] %s1454_s14 }
  0x1f   : > { %466 = vperm.xlu1 %1330, %v417_v3   ;;  %453 = vperm.xlu0 %1329, %v417_v3  }
  0x23   : > { %1332 = vset.pattern.permute.xlu1 %v1532_v6  ;;  %1331 = vset.pattern.permute.xlu0 %v1532_v6 }
  0x24   : > { %481 = vperm.xlu1 %1332, %v417_v3   ;;  %477 = vperm.xlu0 %1331, %v416_v2  }
  0x28   : > { %1333 = vset.pattern.permute.xlu1 %v1533_v9  ;;  %1334 = vset.pattern.permute.xlu0 %v1533_v9 }
  0x29   : > { %490 = vperm.xlu1 %1333, %v416_v2   ;;  %494 = vperm.xlu0 %1334, %v417_v3   ;;  %v1537_v3 = vmov 0.0  }
  0x2a   : > { %660 = vmatprep.mubr.f32.mxu0 %v1537_v3 }
  0x2d   : > { %432 = vrot.lane.b32.xlu1 %v1659_v10, %s1534_s12  ;;  %1391 = vset.pattern.permute.xlu0 %v1531_v1 }
  0x2e   : > { %1390 = vset.pattern.permute.xlu1 %v1531_v1 }
  0x31   : > { %434 = vrot.lane.b32.xlu1 %v1663_v12, %s1534_s12 }
  0x9a   : > { %v463_v13 = vpop.permute.xlu1 %462  ;;  %v449_v14 = vpop.permute.xlu0 %448 }
  0x9b   : > { %v469_v29 = vsel %vm458_vm0, %v463_v13, 0.0  ;;  %v456_v30 = vsel %vm443_vm1, %v449_v14, 0.0 }
  0x9c   : > { %v471_v36 = vadd.f32 %v469_v29, %v456_v30 }
  0x9e   : > { %v467_v15 = vpop.permute.xlu1 %466  ;;  %v454_v17 = vpop.permute.xlu0 %453 }
  0x9f   : > { %v470_v20 = vsel %vm458_vm0, %v467_v15, 0.0  ;;  %v457_v21 = vsel %vm443_vm1, %v454_v17, 0.0 }
  0xa0   : > { %v472_v25 = vadd.f32 %v470_v20, %v457_v21  ;;  %v1708_v21 = vld [vmem:[%s1845_s6] sm:$0xff] }
  0xa3   : > { %v482_v18 = vpop.permute.xlu1 %481  ;;  %v478_v19 = vpop.permute.xlu0 %477 }
  0xa4   : > { %v484_v22 = vsel %vm473_vm2, %v478_v19, 0.0  ;;  %v485_v42 = vsel %vm473_vm2, %v482_v18, 0.0 }
  0xa8   : > { %v491_v23 = vpop.permute.xlu1 %490  ;;  %v495_v33 = vpop.permute.xlu0 %494 }
  0xa9   : > { %v497_v24 = vsel %vm486_vm3, %v491_v23, 0.0  ;;  %v498_v39 = vsel %vm486_vm3, %v495_v33, 0.0 }
  0xaa   : > { %v499_v26 = vadd.f32 %v497_v24, %v484_v22  ;;  %v500_v44 = vadd.f32 %v498_v39, %v485_v42 }
  0xac   : > { %v1340_v27 = vpack.i.bf16 %v472_v25, %v499_v26  ;;  %v433_v28 = vpop.permute.xlu1 %432 }
  0xae   : > { %1341 = vrot.lane.b32.xlu1 %v1340_v27, %s1535_s21  ;;  %v419_v27 = vld [vmem:[%s413_s16] sm:$0xff] }
  0xb0   : > { %v435_v34 = vpop.permute.xlu1 %434 }
  0xb1   : > { %v1681_v35 = vsel %vm436_vm4, %v433_v28, %v435_v34  ;;  %v420_v28 = vld [vmem:[%s413_s16 + $0x8] sm:$0xff]  ;;  %s1456_s16 = scalar_lea.vmem %s1455_s14, 512 }
  0xb2   : > { %v439_v37 = vmul.f32 %v1681_v35, %v414_v31  ;;  %v440_v38 = vmul.f32 %v1681_v35, %v415_v32 }
  0xb4   : > { %v1350_v40 = vpack.i.bf16 %v499_v26, %v439_v37  ;;  %v1335_v41 = vpack.i.bf16 %v439_v37, %v471_v36  ;;  %v1687_v43 = vpack.c.bf16 %v440_v38, %v439_v37  ;;  %v1345_v45 = vpack.i.bf16 %v500_v44, %v440_v38 }
  0xb5   : > { %v1365_v46 = vpack.i.bf16 %v440_v38, %v472_v25  ;;  %v1717_v25 = vld [vmem:[%s1845_s6 + $0x8] sm:$0xff] }
  0xb6   : > { %1351 = vrot.lane.b32.xlu1 %v1350_v40, %s1534_s12  ;;  %1336 = vrot.lane.b32.xlu0 %v1335_v41, %s1535_s21 }
  0xba   : > { %1361 = vrot.lane.b32.xlu1 %v1335_v41, %s1536_s22  ;;  %1346 = vrot.lane.b32.xlu0 %v1345_v45, %s1535_s21 }
  0xbe   : > { %1356 = vrot.lane.b32.xlu0 %v1345_v45, %s1534_s12 }
  0xc2   : > { %1366 = vrot.lane.b32.xlu0 %v1365_v46, %s1536_s22  ;;  %v534_v46 = vld [vmem:[%s1843_s4] sm:$0xff] }
 0x120   : > { %v1342_v47 = vpop.permute.xlu1 %1341 }
 0x121   : > { %v1343_v48 = vunpack.i.l.bf16 %v1342_v47  ;;  %v1344_v59 = vunpack.i.h.bf16 %v1342_v47  ;;  %v535_v47 = vld [vmem:[%s1843_s4 + $0x8] sm:$0xff] }
 0x128   : > { %v1352_v49 = vpop.permute.xlu1 %1351  ;;  %v1337_v50 = vpop.permute.xlu0 %1336 }
 0x129   : > { %v1354_v51 = vunpack.i.h.bf16 %v1352_v49  ;;  %v1353_v52 = vunpack.i.l.bf16 %v1352_v49  ;;  %v1339_v53 = vunpack.i.h.bf16 %v1337_v50  ;;  %v1338_v54 = vunpack.i.l.bf16 %v1337_v50 }
 0x12b   : > { %v520_v55 = vsel %vm519_vm5, %v1338_v54, %v1339_v53  ;;  %v521_v56 = vsel %vm519_vm5, %v1339_v53, %v1343_v48  ;;  %v532_v60 = vsel %vm436_vm4, %v1353_v52, %v1354_v51 }
 0x12c   : > { %v1347_v57 = vpop.permute.xlu0 %1346  ;;  %v1370_v58 = vpack.i.bf16 %v521_v56, %v520_v55  ;;  %v1380_v4 = vpack.i.bf16 %v532_v60, %v1353_v52  ;;  %v1362_v5 = vpop.permute.xlu1 %1361 }
 0x12d   : > { %v1349_v61 = vunpack.i.h.bf16 %v1347_v57  ;;  %v1348_v62 = vunpack.i.l.bf16 %v1347_v57  ;;  %v1364_v14 = vunpack.i.h.bf16 %v1362_v5  ;;  %v1363_v15 = vunpack.i.l.bf16 %v1362_v5 }
 0x12e   : > { %1371 = vrot.lane.b32.xlu1 %v1370_v58, %s1536_s22 }
 0x12f   : > { %v522_v63 = vsel %vm519_vm5, %v1344_v59, %v1348_v62  ;;  %v523_v2 = vsel %vm519_vm5, %v1348_v62, %v1349_v61  ;;  %v571_v23 = vsel %vm570_vm6, %v1363_v15, %v1364_v14 }
 0x130   : > { %v1357_v7 = vpop.permute.xlu0 %1356  ;;  %v1375_v8 = vpack.i.bf16 %v523_v2, %v522_v63 }
 0x131   : > { %v1359_v11 = vunpack.i.h.bf16 %v1357_v7  ;;  %v1358_v13 = vunpack.i.l.bf16 %v1357_v7 }
 0x132   : > { %1376 = vrot.lane.b32.xlu0 %v1375_v8, %s1536_s22  ;;  %1381 = vrot.lane.b32.xlu1 %v1380_v4, %s1536_s22 }
 0x133   : > { %v533_v16 = vsel %vm436_vm4, %v1358_v13, %v1359_v11 }
 0x134   : > { %v1385_v17 = vpack.i.bf16 %v533_v16, %v1358_v13  ;;  %v1367_v18 = vpop.permute.xlu0 %1366 }
 0x135   : > { %v1369_v19 = vunpack.i.h.bf16 %v1367_v18  ;;  %v1368_v20 = vunpack.i.l.bf16 %v1367_v18 }
 0x136   : > { %1386 = vrot.lane.b32.xlu0 %v1385_v17, %s1536_s22  ;;  %538 = vperm.xlu1 %1390, %v1708_v21   ;;  %s383_s22 = scalar_lea.vmem [#allocation2], %s1172_s19 }
 0x137   : > { %v1235_v22 = vpack.c.bf16 %v1369_v19, %v1364_v14  ;;  %v572_v24 = vsel %vm570_vm6, %v1368_v20, %v1369_v19  ;;  %s1038_s23 = sshll.u32 %s383_s22, 4  ;;  %s1786_s23 = int_to_ptr.vmem [resolvable:$true] %s1038_s23 }
 0x138   : > { %v1237_v26 = vpack.c.bf16 %v572_v24, %v571_v23  ;;  %s1450_s26 = scalar_lea.vmem %s1786_s23, 256  ;;  %p1457_p1 = scmp.lt.s32.totalorder %s1786_s23, %s1455_s14 }
 0x139   : > { %1236 = vmatprep.subr.bf16.mxu0 %v1235_v22  ;;  %p1451_p12 = scmp.ne.s32.totalorder %s1786_s23, %s1450_s26  ;;  %p1458_p2 = scmp.lt.s32.totalorder %s1456_s16, %s1450_s26 }
 0x13a   : > { %1238 = vmatpush1.bf16.msra.mxu0 %v1237_v26  ;;  %543 = vperm.xlu0 %1391, %v1717_v25  }
 0x13b   : > { %1392 = vset.pattern.permute.xlu1 %v1530_v0  ;;  %p1452_p13 = pnand %p1451_p12, %p1627_p4  ;;  %p1459_p3 = por %p1458_p2, %p1457_p1 }
 0x13c   : > { %704 = vperm.xlu1 %1392, %v1708_v21  }
 0x13d   : > { %p1453_p0 = pneg %p1452_p13 }
 0x13e   : > { %745 = vperm.xlu0 %1391, %v419_v27  }
 0x13f   : > { %p1460_p5 = pnand %p1459_p3, %p1453_p0 }
 0x140   : > { %708 = vperm.xlu1 %1392, %v1717_v25  }
 0x142   : > { %757 = vrot.lane.b32.xlu0 %v1659_v10, %s1535_s21 }
 0x143   : > { %1414 = vset.pattern.permute.xlu0 %v1532_v6 }
 0x144   : > { %1393 = vset.pattern.permute.xlu1 %v1531_v1 }
 0x145   : > { %750 = vperm.xlu1 %1393, %v420_v28  }
 0x149   : > { %759 = vrot.lane.b32.xlu1 %v1663_v12, %s1535_s21 }
 0x14a   : > { %1415 = vset.pattern.permute.xlu1 %v1532_v6 }
 0x1a0   : > { %v1372_v0 = vpop.permute.xlu1 %1371 }
 0x1a1   : > { %v1374_v29 = vunpack.i.h.bf16 %v1372_v0  ;;  %v1373_v30 = vunpack.i.l.bf16 %v1372_v0 }
 0x1a3   : > { %v573_v36 = vsel %vm570_vm6, %v1373_v30, %v1374_v29 }
 0x1a4   : > { %v1377_v31 = vpop.permute.xlu0 %1376  ;;  %v1382_v32 = vpop.permute.xlu1 %1381 }
 0x1a5   : > { %v1379_v33 = vunpack.i.h.bf16 %v1377_v31  ;;  %v1378_v34 = vunpack.i.l.bf16 %v1377_v31  ;;  %v1384_v37 = vunpack.i.h.bf16 %v1382_v32  ;;  %v1383_v38 = vunpack.i.l.bf16 %v1382_v32 }
 0x1a7   : > { %v1239_v10 = vpack.c.bf16 %v1379_v33, %v1374_v29  ;;  %v574_v1 = vsel %vm570_vm6, %v1378_v34, %v1379_v33  ;;  %v575_v42 = vsel %vm570_vm6, %v1383_v38, %v1384_v37 }
 0x1a8   : > { %v1387_v39 = vpop.permute.xlu0 %1386  ;;  %v1241_v40 = vpack.c.bf16 %v574_v1, %v573_v36 }
 0x1a9   : > { %v1389_v41 = vunpack.i.h.bf16 %v1387_v39  ;;  %v1388_v12 = vunpack.i.l.bf16 %v1387_v39  ;;  %1240 = vmatprep.subr.bf16.mxu0 %v1239_v10 }
 0x1aa   : > { %1242 = vmatpush1.bf16.msra.mxu0 %v1241_v40 }
 0x1ab   : > { %v1243_v6 = vpack.c.bf16 %v1389_v41, %v1384_v37  ;;  %v576_v44 = vsel %vm570_vm6, %v1388_v12, %v1389_v41 }
 0x1ac   : > { %v1245_v45 = vpack.c.bf16 %v576_v44, %v575_v42 }
 0x1ad   : > { %1244 = vmatprep.subr.bf16.mxu0 %v1243_v6 }
 0x1ae   : > { %1246 = vmatpush1.bf16.msra.mxu0 %v1245_v45 }
 0x1b1   : > { %1180 = vmatmul.mubr.msk.f32.vlgmr.msra.gmra.mrb[0].mxu0 %vm589_vm7, %v534_v46 }
 0x1b2   : > { %666 = vmatprep.mubr.f32.mxu0 %v1537_v3 }
 0x1b5   : > { %1181 = vmatmul.mubr.msk.f32.gmra.mrb[2].mxu0 %vm589_vm7, %v535_v47  ;;  %v539_v48 = vpop.permute.xlu1 %538 }
 0x1b9   : > { %v544_v53 = vpop.permute.xlu0 %543 }
 0x1bb   : > { %v705_v26 = vpop.permute.xlu1 %704 }
 0x1bf   : > { %v709_v30 = vpop.permute.xlu1 %708 }
 0x1c4   : > { %v751_v47 = vpop.permute.xlu1 %750 }
 0x284   : > { %v662_v49 = vpop.f32.mrb[0].mxu0 }
 0x285   : > { %v664_v50 = vpop.f32.mrb[1].mxu0  ;;  %v663_v52 = vadd.f32 %v662_v49, %v539_v48 }
 0x286   : > { %v665_v51 = vadd.f32 %v664_v50, %v539_v48  ;;  %v746_v48 = vpop.permute.xlu0 %745  ;;  %v760_v50 = vpop.permute.xlu1 %759 }
 0x287   : > { %v673_v59 = vmul.f32 %v663_v52, %v663_v52 }
 0x288   : > { %v668_v54 = vpop.f32.mrb[2].mxu0  ;;  %v674_v57 = vmul.f32 %v665_v51, %v665_v51 }
 0x289   : > { %v669_v55 = vadd.f32 %v668_v54, %v544_v53  ;;  %v670_v56 = vpop.f32.mrb[3].mxu0 }
 0x28a   : > { %v671_v58 = vadd.f32 %v670_v56, %v544_v53  ;;  %v684_v63 = vsel %vm570_vm6, %v674_v57, 0.0  ;;  %v758_v49 = vpop.permute.xlu0 %757 }
 0x28b   : > { %v675_v60 = vmul.f32 %v669_v55, %v669_v55  ;;  %v761_v56 = vsel %vm519_vm5, %v758_v49, %v760_v50 }
 0x28c   : > { %v676_v61 = vmul.f32 %v671_v58, %v671_v58 }
 0x28d   : > { %v677_v62 = vadd.f32 %v675_v60, %v673_v59 }
 0x28e   : > { %v685_v2 = vsel %vm570_vm6, %v676_v61, 0.0 }
 0x28f   : > { %v678_v3 = vrot.slane %v677_v62, 4  ;;  %v686_v4 = vadd.f32 %v685_v2, %v684_v63 }
 0x291   : > { %v679_v5 = vadd.f32 %v678_v3, %v677_v62  ;;  %v687_v7 = vrot.slane %v686_v4, 4 }
 0x293   : > { %v680_v8 = vrot.slane %v679_v5, 2  ;;  %v688_v11 = vadd.f32 %v687_v7, %v686_v4 }
 0x295   : > { %v681_v13 = vadd.f32 %v680_v8, %v679_v5  ;;  %v689_v14 = vrot.slane %v688_v11, 2 }
 0x297   : > { %v682_v15 = vrot.slane %v681_v13, 1  ;;  %v690_v16 = vadd.f32 %v689_v14, %v688_v11  ;;  %v1538_v14 = vmov 4  }
 0x299   : > { %v683_v17 = vadd.f32 %v682_v15, %v681_v13  ;;  %v691_v18 = vrot.slane %v690_v16, 1  ;;  %v796_v13 = vld [vmem:[%s1844_s5] sm:$0xff] }
 0x29a   : > { %1225 = vmatprep.mubr.msk.f32.mxu1 %vm589_vm7, %v796_v13 }
 0x29b   : > { %v693_v19 = vmul.f32 0.125, %v683_v17  ;;  %v692_v20 = vadd.f32 %v691_v18, %v690_v16 }
 0x29d   : > { %v695_v22 = vadd.f32 1e-06, %v693_v19  ;;  %v694_v23 = vmul.f32 0.125, %v692_v20 }
 0x29f   : > { %1420 = vrsqrt.f32 %v695_v22  ;;  %v696_v24 = vadd.f32 1e-06, %v694_v23 }
 0x2a1   : > { %1422 = vrsqrt.f32 %v696_v24 }
 0x2a9   : > { %v1421_v27 = vpop.eup %1420 }
 0x2aa   : > { %v701_v28 = vmul.f32 %v1421_v27, %v669_v55  ;;  %v699_v0 = vmul.f32 %v1421_v27, %v663_v52 }
 0x2ab   : > { %v1423_v29 = vpop.eup %1422 }
 0x2ac   : > { %v702_v31 = vmul.f32 %v1423_v29, %v671_v58  ;;  %v700_v32 = vmul.f32 %v1423_v29, %v665_v51  ;;  %v711_v33 = vmul.f32 %v705_v26, %v699_v0  ;;  %v713_v34 = vmul.f32 %v709_v30, %v701_v28 }
 0x2ae   : > { %v712_v36 = vmul.f32 %v705_v26, %v700_v32  ;;  %v1182_v10 = vmul.f32 -1.442695, %v711_v33  ;;  %v714_v37 = vmul.f32 %v709_v30, %v702_v31  ;;  %v1184_v38 = vmul.f32 -1.442695, %v713_v34  ;;  %v797_v31 = vld [vmem:[%s1844_s5 + $0x8] sm:$0xff]  ;;  %v927_v32 = vld [vmem:[%s1846_s7] sm:$0xff] }
 0x2b0   : > { %1424 = vpow2.f32 %v1182_v10  ;;  %v1183_v1 = vmul.f32 -1.442695, %v712_v36  ;;  %v1185_v39 = vmul.f32 -1.442695, %v714_v37 }
 0x2b1   : > { %1426 = vpow2.f32 %v1184_v38 }
 0x2b2   : > { %1428 = vpow2.f32 %v1183_v1 }
 0x2b3   : > { %1430 = vpow2.f32 %v1185_v39 }
 0x2ba   : > { %v1425_v40 = vpop.eup %1424 }
 0x2bb   : > { %v1427_v41 = vpop.eup %1426  ;;  %v727_v12 = vadd.f32 1.0, %v1425_v40 }
 0x2bc   : > { %v1429_v6 = vpop.eup %1428  ;;  %v729_v42 = vadd.f32 1.0, %v1427_v41 }
 0x2bd   : > { %v1431_v44 = vpop.eup %1430  ;;  %v728_v45 = vadd.f32 1.0, %v1429_v6  ;;  %1432 = vrcp.f32 %v727_v12 }
 0x2be   : > { %v730_v46 = vadd.f32 1.0, %v1431_v44  ;;  %1434 = vrcp.f32 %v729_v42 }
 0x2bf   : > { %1436 = vrcp.f32 %v728_v45 }
 0x2c0   : > { %1438 = vrcp.f32 %v730_v46 }
 0x2c7   : > { %v1433_v51 = vpop.eup %1432 }
 0x2c8   : > { %v1435_v52 = vpop.eup %1434  ;;  %v739_v53 = vmul.f32 %v1433_v51, %v711_v33  ;;  %v928_v33 = vld [vmem:[%s1846_s7 + $0x8] sm:$0xff] }
 0x2c9   : > { %v1437_v54 = vpop.eup %1436  ;;  %v741_v55 = vmul.f32 %v1435_v52, %v713_v34 }
 0x2ca   : > { %v1439_v57 = vpop.eup %1438  ;;  %v740_v58 = vmul.f32 %v1437_v54, %v712_v36  ;;  %v753_v59 = vadd.f32 %v746_v48, %v739_v53 }
 0x2cb   : > { %v742_v60 = vmul.f32 %v1439_v57, %v714_v37  ;;  %v755_v61 = vadd.f32 %v751_v47, %v741_v55 }
 0x2cc   : > { %v754_v62 = vadd.f32 %v746_v48, %v740_v58  ;;  %v764_v63 = vmul.f32 %v761_v56, %v753_v59 }
 0x2cd   : > { %v756_v2 = vadd.f32 %v751_v47, %v742_v60  ;;  %v766_v3 = vmul.f32 %v761_v56, %v755_v61 }
 0x2ce   : > { %v765_v4 = vmul.f32 %v760_v50, %v754_v62 }
 0x2cf   : > { %v767_v5 = vmul.f32 %v760_v50, %v756_v2  ;;  %v1247_v7 = vpack.c.bf16 %v766_v3, %v764_v63 }
 0x2d0   : > { %v1394_v8 = vpack.i.bf16 %v765_v4, %v764_v63 }
 0x2d1   : > { %1248 = vmatprep.subr.bf16.mxu1 %v1247_v7  ;;  %v1399_v11 = vpack.i.bf16 %v767_v5, %v766_v3 }
 0x2d2   : > { %1250 = vmatpush3.bf16.msra.mxu1 %v1247_v7  ;;  %1395 = vrot.lane.b32.xlu0 %v1394_v8, %s1535_s21 }
 0x2d3   : > { %1400 = vrot.lane.b32.xlu1 %v1399_v11, %s1535_s21  ;;  %s1791_s21 = scalar_lea.hbm %s1847_s8, %s1200_s24 }
 0x2d6   : > { %1405 = vrot.lane.b32.xlu0 %v1394_v8, %s1534_s12 }
 0x2d7   : > { %1410 = vrot.lane.b32.xlu1 %v1399_v11, %s1534_s12 }
 0x2da   : > { %799 = vperm.xlu0 %1414, %v1708_v21  }
 0x2db   : > { %803 = vperm.xlu1 %1415, %v1717_v25  }
 0x2de   : > { %1417 = vset.pattern.permute.xlu0 %v1533_v9 }
 0x2df   : > { %1416 = vset.pattern.permute.xlu1 %v1533_v9  ;;  %906 = vperm.xlu0 %1417, %v1717_v25  }
 0x2e0   : > { %902 = vperm.xlu1 %1416, %v1708_v21  }
 0x2e3   : > { %1419 = vset.pattern.permute.xlu0 %v1538_v14 }
 0x2e4   : > { %1418 = vset.pattern.permute.xlu1 %v1538_v14 }
 0x2e5   : > { %930 = vperm.xlu1 %1418, %v1708_v21  }
 0x2e9   : > { %934 = vperm.xlu1 %1418, %v1717_v25  }
 0x344   : > { %v1396_v15 = vpop.permute.xlu0 %1395 }
 0x345   : > { %v1401_v16 = vpop.permute.xlu1 %1400  ;;  %v1398_v17 = vunpack.i.h.bf16 %v1396_v15  ;;  %v1397_v18 = vunpack.i.l.bf16 %v1396_v15 }
 0x346   : > { %v1403_v19 = vunpack.i.h.bf16 %v1401_v16  ;;  %v1402_v20 = vunpack.i.l.bf16 %v1401_v16 }
 0x347   : > { %v780_v22 = vsel %vm519_vm5, %v1397_v18, %v1398_v17 }
 0x348   : > { %v1406_v9 = vpop.permute.xlu0 %1405  ;;  %v781_v23 = vsel %vm519_vm5, %v1402_v20, %v1403_v19 }
 0x349   : > { %v1411_v24 = vpop.permute.xlu1 %1410  ;;  %v1408_v26 = vunpack.i.h.bf16 %v1406_v9  ;;  %v1407_v27 = vunpack.i.l.bf16 %v1406_v9  ;;  %v1251_v28 = vpack.c.bf16 %v781_v23, %v780_v22 }
 0x34a   : > { %v1413_v0 = vunpack.i.h.bf16 %v1411_v24  ;;  %v1412_v29 = vunpack.i.l.bf16 %v1411_v24 }
 0x34b   : > { %1252 = vmatprep.subr.bf16.mxu1 %v1251_v28  ;;  %v792_v21 = vsel %vm436_vm4, %v1407_v27, %v1408_v26 }
 0x34c   : > { %1254 = vmatpush3.bf16.msra.mxu1 %v1251_v28  ;;  %v793_v25 = vsel %vm436_vm4, %v1412_v29, %v1413_v0 }
 0x34d   : > { %v1255_v30 = vpack.c.bf16 %v793_v25, %v792_v21 }
 0x34f   : > { %1256 = vmatprep.subr.bf16.mxu1 %v1255_v30 }
 0x350   : > { %1258 = vmatpush3.bf16.msra.mxu1 %v1255_v30 }
 0x351   : > { %1260 = vmatprep.subr.bf16.mxu1 %v1687_v43 }
 0x353   : > { %1226 = vmatmul.mubr.msk.f32.vlgmr.msra.gmra.mrb[0].mxu1 %vm589_vm7, %v797_v31 }
 0x354   : > { %1262 = vmatpush3.bf16.msra.mxu1 %v1687_v43  ;;  %1232 = vmatprep.mubr.msk.f32.mxu1 %vm937_vm8, %v927_v32 }
 0x357   : > { %1233 = vmatmul.mubr.msk.f32.vlgmr.msra.gmra.mrb[2].mxu1 %vm937_vm8, %v928_v33 }
 0x359   : > { %v800_v36 = vpop.permute.xlu0 %799 }
 0x35a   : > { %v804_v34 = vpop.permute.xlu1 %803 }
 0x35e   : > { %v907_v52 = vpop.permute.xlu0 %906 }
 0x35f   : > { %v903_v51 = vpop.permute.xlu1 %902 }
 0x364   : > { %v931_v63 = vpop.permute.xlu1 %930 }
 0x368   : > { %v935_v5 = vpop.permute.xlu1 %934 }
 0x426   : > { %v1227_v10 = vpop.f32.mrb[0].mxu1 }
 0x427   : > { %v884_v37 = vadd.f32 %v1227_v10, %v804_v34  ;;  %v878_v38 = vpop.f32.mrb[1].mxu1 }
 0x428   : > { %v879_v1 = vadd.f32 %v878_v38, %v800_v36 }
 0x429   : > { %v888_v39 = vmul.f32 %v884_v37, %v884_v37 }
 0x42a   : > { %v887_v40 = vmul.f32 %v879_v1, %v879_v1  ;;  %v1234_v41 = vpop.f32.mrb[2].mxu1 }
 0x42b   : > { %v1010_v12 = vpop.f32.mrb[3].mxu1  ;;  %v1016_v14 = vadd.f32 %v1234_v41, %v935_v5 }
 0x42c   : > { %v889_v6 = vadd.f32 %v888_v39, %v887_v40  ;;  %v1011_v11 = vadd.f32 %v1010_v12, %v931_v63 }
 0x42e   : > { %v890_v42 = vrot.slane %v889_v6, 4 }
 0x430   : > { %v891_v44 = vadd.f32 %v890_v42, %v889_v6 }
 0x432   : > { %v892_v43 = vrot.slane %v891_v44, 2 }
 0x434   : > { %v893_v45 = vadd.f32 %v892_v43, %v891_v44 }
 0x436   : > { %v894_v46 = vrot.slane %v893_v45, 1 }
 0x438   : > { %v895_v47 = vadd.f32 %v894_v46, %v893_v45 }
 0x43a   : > { %v896_v48 = vmul.f32 0.125, %v895_v47 }
 0x43c   : > { %v897_v49 = vadd.f32 1e-06, %v896_v48 }
 0x43e   : > { %1440 = vrsqrt.f32 %v897_v49 }
 0x448   : > { %v1441_v50 = vpop.eup %1440 }
 0x449   : > { %v899_v53 = vmul.f32 %v1441_v50, %v879_v1  ;;  %v900_v54 = vmul.f32 %v1441_v50, %v884_v37 }
 0x44b   : > { %v909_v55 = vmul.f32 %v903_v51, %v899_v53  ;;  %v910_v56 = vmul.f32 %v907_v52, %v900_v54 }
 0x44d   : > { %v1188_v57 = vmul.f32 -1.442695, %v909_v55  ;;  %v1189_v58 = vmul.f32 -1.442695, %v910_v56 }
 0x44f   : > { %1442 = vpow2.f32 %v1188_v57 }
 0x450   : > { %1444 = vpow2.f32 %v1189_v58 }
 0x459   : > { %v1443_v59 = vpop.eup %1442 }
 0x45a   : > { %v1445_v60 = vpop.eup %1444  ;;  %v917_v61 = vadd.f32 1.0, %v1443_v59 }
 0x45b   : > { %v918_v62 = vadd.f32 1.0, %v1445_v60 }
 0x45c   : > { %1446 = vrcp.f32 %v917_v61 }
 0x45d   : > { %1448 = vrcp.f32 %v918_v62 }
 0x466   : > { %v1447_v2 = vpop.eup %1446 }
 0x467   : > { %v1449_v3 = vpop.eup %1448  ;;  %v923_v4 = vmul.f32 %v1447_v2, %v909_v55 }
 0x468   : > { %v924_v7 = vmul.f32 %v1449_v3, %v910_v56 }
 0x469   : > { %v925_v8 = vmul.f32 %v923_v4, %v1681_v35 }
 0x46a   : > { %v926_v13 = vmul.f32 %v924_v7, %v1681_v35 }
 0x46b   : > { %v1019_v15 = vadd.f32 %v1011_v11, %v925_v8 }
 0x46c   : > { %v1020_v16 = vadd.f32 %v1016_v14, %v926_v13 }
 0x46d   : > { %1021 = vst [vmem:[%s383_s22] sm:$0xff] %v1019_v15 }
 0x46e   : > { %1022 = vst [vmem:[%s383_s22 + $0x8] sm:$0xff] %v1020_v16 }
 0x46f   : > { %1463 = shalt.err (!%p1460_p5)
}
 0x470   : > { %s1464_s20 = scalar_lea.hbm %s1791_s21, 256  ;;  %s1468_s24 = scalar_lea.hbm %s1847_s8, 512 }
 0x471   : > { %p1465_p6 = scmp.ne.s32.totalorder %s1791_s21, %s1464_s20  ;;  %p1469_p10 = scmp.lt.u32.totalorder %s1791_s21, %s1847_s8 }
 0x472   : > { %p1470_p11 = scmp.lt.u32.totalorder %s1468_s24, %s1464_s20  ;;  %p1472_p13 = scmp.lt.u32.totalorder %s1464_s20, %s1791_s21 }
 0x473   : > { %p1466_p7 = pnand %p1465_p6, %p1627_p4 }
 0x474   : > { %p1471_p12 = por %p1470_p11, %p1469_p10 }
 0x475   : > { %p1467_p9 = pneg %p1466_p7 }
 0x476   : > { %p1473_p0 = por %p1472_p13, %p1471_p12 }
 0x478   : > { %p1474_p1 = pnand %p1473_p0, %p1467_p9 }
 0x47a   : > { %1477 = shalt.err (!%p1474_p1)
}
 0x47b   : > { %s1540_s26 = smov 128   ;;  %s1541_s11 = smov 8  }
 0x47c   : > { %1263 = dma.vmem_to_hbm [thread:$0]  (%p1627_p4), %s1786_s23, 256, %s1791_s21, %s1793_s30, %s1540_s26, %s1540_s26, %s1541_s11  }
 0x47d PF: > { %p1269_p2 = scmp.ge.s32.totalorder %s1528_s10, 2  ;;  %s1053_s14 = sand.u32 1, %s1508_s27  }
 0x47e   : > { %s1054_s16 = scalar_lea.sflag [#allocation3], %s1053_s14 }
 0x47f   : > { %p1266_p3 = pnand %p1269_p2, %p1634_p8 }
 0x481   : > { %1503 = dma.done.wait (!%p1266_p3), %s1054_s16, 256  }
 0x482   : > { %1505 = vsyncadd (!%p1266_p3), %s1054_s16, 4294967040  ;;  %s21_s10 = sadd.s32 1, %s1528_s10   ;;  %s1850_s27 = smov %s1512_s28 }
 0x483   : > { %p18_p5 = scmp.ge.s32.totalorder %s21_s10, 4   ;;  %s1851_s28 = smov %s1516_s29 }
 0x484   : > { %s1852_s29 = smov %s1640_s18  ;;  %s1853_s30 = smov %s1524_s9 }
 0x485   : > { %s1854_s9 = smov %s1856_s13  ;;  %20 = sbr.rel (!%p18_p5) target bundleno = 4 (0x4), region = 96 }
 0x48c   :  { %1059 = vsyncpa [#allocation3], 1 }
 0x48d   :  { %1061 = vsyncpa [#allocation3 + $0x1], 1 }

</bundles_post_ra>
